<compile_context>
chip_gen: v6e
topology: v6e:2x2x1
jax: 0.10.0
libtpu: 0.0.40
codegen_flags: <defaults>
</compile_context>

<pallas_src>
import jax
import jax.numpy as jnp
from jax import lax
from jax.experimental import pallas as pl
from jax.experimental.pallas import tpu as pltpu


def _pad_value(dtype):
    """Identity element for max, matching PyTorch max_pool2d padding semantics."""
    dtype = jnp.dtype(dtype)
    if jnp.issubdtype(dtype, jnp.floating):
        return -jnp.inf
    return jnp.iinfo(dtype).min


def _pool3_1d(x, axis):
    """Stride-1, width-3 max pool along `axis` with 'same' padding (pad = -inf)."""
    n = x.shape[axis]
    if n == 1:
        return x
    strip_shape = list(x.shape)
    strip_shape[axis] = 1
    neg = jnp.full(strip_shape, _pad_value(x.dtype), x.dtype)
    # up[i] = x[i+1] (last position padded), dn[i] = x[i-1] (first position padded)
    up = jnp.concatenate([lax.slice_in_dim(x, 1, n, axis=axis), neg], axis=axis)
    dn = jnp.concatenate([neg, lax.slice_in_dim(x, 0, n - 1, axis=axis)], axis=axis)
    return jnp.maximum(x, jnp.maximum(up, dn))


def spp_kernel(x_ref, o_ref):
    x = x_ref[...]                                   # (TN, TC, H, W)
    h3 = _pool3_1d(x, axis=2)                        # width-3 pool over H
    p3 = _pool3_1d(h3, axis=3)                       # 3x3 pool (reuses h3)
    # 5x5 pool = 3x3 pool applied to the 3x3 pool (max of maxes, same window).
    p5 = _pool3_1d(_pool3_1d(p3, axis=2), axis=3)
    o_ref[:, 0] = x                                  # identity branch
    o_ref[:, 1] = p3                                 # max_pool2d(x, 3, 1, 1)
    o_ref[:, 2] = p5                                 # max_pool2d(x, 5, 1, 2)


def _largest_divisor_leq(n, cap):
    cap = int(max(1, min(n, cap)))
    for d in range(cap, 0, -1):
        if n % d == 0:
            return d
    return 1


def _pick_tiles(N, C, plane_bytes, budget_bytes=2 << 20):
    """Batch (TN, TC) planes per grid step, ~budget_bytes of input per block."""
    max_planes = max(1, budget_bytes // max(1, plane_bytes))
    tc = _largest_divisor_leq(C, max_planes)
    tn = 1
    if tc == C:
        tn = _largest_divisor_leq(N, max(1, max_planes // C))
    # Keep at least 2 grid steps when possible so v7x's 2 TensorCores both work.
    if (N // tn) * (C // tc) < 2:
        if tn > 1:
            tn = _largest_divisor_leq(N, max(1, tn // 2))
        elif tc > 1:
            tc = _largest_divisor_leq(C, max(1, tc // 2))
    return tn, tc


def spp_forward(x):
    """x: (N, C, H, W) -> (N, 3*C, H, W) == cat([x, maxpool3(x), maxpool5(x)], dim=1)."""
    N, C, H, W = x.shape
    plane_bytes = H * W * x.dtype.itemsize
    TN, TC = _pick_tiles(N, C, plane_bytes)
    grid = (N // TN, C // TC)

    out = pl.pallas_call(
        spp_kernel,
        grid=grid,
        in_specs=[pl.BlockSpec((TN, TC, H, W), lambda n, c: (n, c, 0, 0))],
        out_specs=pl.BlockSpec((TN, 3, TC, H, W), lambda n, c: (n, 0, c, 0, 0)),
        out_shape=jax.ShapeDtypeStruct((N, 3, C, H, W), x.dtype),
        compiler_params=pltpu.CompilerParams(
            dimension_semantics=("parallel", "parallel"),
            vmem_limit_bytes=32 * 1024 * 1024,
        ),
    )(x)

    # (N, 3, C, H, W) -> (N, 3C, H, W): contiguous dim-merge (free); channel
    # order [x, pool3, pool5] matches the torch.cat semantics exactly.
    return out.reshape(N, 3 * C, H, W)


def _ref_pool(x, k):
    """Pure-JAX reference for max_pool2d(x, k, stride=1, padding=k//2) in NCHW."""
    p = k // 2
    return lax.reduce_window(
        x, -jnp.inf, lax.max,
        window_dimensions=(1, 1, k, k),
        window_strides=(1, 1, 1, 1),
        padding=[(0, 0), (0, 0), (p, p), (p, p)],
    )


if __name__ == "__main__":
    key = jax.random.PRNGKey(0)
    x = jax.random.normal(key, (2, 4, 16, 16), dtype=jnp.float32)

    out = jax.block_until_ready(spp_forward(x))

    # Reference check against PyTorch semantics (exact: max is order-insensitive).
    ref = jnp.concatenate([x, _ref_pool(x, 3), _ref_pool(x, 5)], axis=1)
    assert out.shape == (2, 12, 16, 16), out.shape
    assert jnp.array_equal(out, ref), "mismatch vs reference"

    print("KERNEL_OK")
</pallas_src>

<mosaic_0001>
module attributes {stable_mosaic.version = 11 : i64} {
  func.func @spp_kernel(%arg0: i32, %arg1: i32, %arg2: memref<1x4x16x16xf32, #tpu.memory_space<vmem>>, %arg3: memref<1x3x4x16x16xf32, #tpu.memory_space<vmem>>) attributes {dimension_semantics = [#tpu.dimension_semantics<parallel>, #tpu.dimension_semantics<parallel>], iteration_bounds = array<i64: 2, 1>, scalar_prefetch = 0 : i64, scratch_operands = 0 : i64, tpu.core_type = #tpu.core_type<tc>, window_params = [{transform_indices = @transform_0, window_bounds = array<i64: 1, 4, 16, 16>}, {transform_indices = @transform_1, window_bounds = array<i64: 1, 3, 4, 16, 16>}]} {
    %c0 = arith.constant 0 : index
    %c0_0 = arith.constant 0 : index
    %c0_1 = arith.constant 0 : index
    %c0_2 = arith.constant 0 : index
    %0 = vector.load %arg2[%c0, %c0_0, %c0_1, %c0_2] : memref<1x4x16x16xf32, #tpu.memory_space<vmem>>, vector<1x4x16x16xf32>
    %cst = arith.constant 0xFF800000 : f32
    %1 = vector.broadcast %cst : f32 to vector<1x4x1x16xf32>
    %2 = vector.extract_strided_slice %0 {offsets = [0, 0, 1, 0], sizes = [1, 4, 15, 16], strides = [1, 1, 1, 1]} : vector<1x4x16x16xf32> to vector<1x4x15x16xf32>
    %3 = tpu.concatenate %2, %1 in 2 : vector<1x4x15x16xf32>, vector<1x4x1x16xf32> -> vector<1x4x16x16xf32>
    %4 = vector.extract_strided_slice %0 {offsets = [0, 0, 0, 0], sizes = [1, 4, 15, 16], strides = [1, 1, 1, 1]} : vector<1x4x16x16xf32> to vector<1x4x15x16xf32>
    %5 = tpu.concatenate %1, %4 in 2 : vector<1x4x1x16xf32>, vector<1x4x15x16xf32> -> vector<1x4x16x16xf32>
    %6 = arith.maximumf %3, %5 : vector<1x4x16x16xf32>
    %7 = arith.maximumf %0, %6 : vector<1x4x16x16xf32>
    %cst_3 = arith.constant 0xFF800000 : f32
    %8 = vector.broadcast %cst_3 : f32 to vector<1x4x16x1xf32>
    %9 = vector.extract_strided_slice %7 {offsets = [0, 0, 0, 1], sizes = [1, 4, 16, 15], strides = [1, 1, 1, 1]} : vector<1x4x16x16xf32> to vector<1x4x16x15xf32>
    %10 = tpu.concatenate %9, %8 in 3 : vector<1x4x16x15xf32>, vector<1x4x16x1xf32> -> vector<1x4x16x16xf32>
    %11 = vector.extract_strided_slice %7 {offsets = [0, 0, 0, 0], sizes = [1, 4, 16, 15], strides = [1, 1, 1, 1]} : vector<1x4x16x16xf32> to vector<1x4x16x15xf32>
    %12 = tpu.concatenate %8, %11 in 3 : vector<1x4x16x1xf32>, vector<1x4x16x15xf32> -> vector<1x4x16x16xf32>
    %13 = arith.maximumf %10, %12 : vector<1x4x16x16xf32>
    %14 = arith.maximumf %7, %13 : vector<1x4x16x16xf32>
    %cst_4 = arith.constant 0xFF800000 : f32
    %15 = vector.broadcast %cst_4 : f32 to vector<1x4x1x16xf32>
    %16 = vector.extract_strided_slice %14 {offsets = [0, 0, 1, 0], sizes = [1, 4, 15, 16], strides = [1, 1, 1, 1]} : vector<1x4x16x16xf32> to vector<1x4x15x16xf32>
    %17 = tpu.concatenate %16, %15 in 2 : vector<1x4x15x16xf32>, vector<1x4x1x16xf32> -> vector<1x4x16x16xf32>
    %18 = vector.extract_strided_slice %14 {offsets = [0, 0, 0, 0], sizes = [1, 4, 15, 16], strides = [1, 1, 1, 1]} : vector<1x4x16x16xf32> to vector<1x4x15x16xf32>
    %19 = tpu.concatenate %15, %18 in 2 : vector<1x4x1x16xf32>, vector<1x4x15x16xf32> -> vector<1x4x16x16xf32>
    %20 = arith.maximumf %17, %19 : vector<1x4x16x16xf32>
    %21 = arith.maximumf %14, %20 : vector<1x4x16x16xf32>
    %cst_5 = arith.constant 0xFF800000 : f32
    %22 = vector.broadcast %cst_5 : f32 to vector<1x4x16x1xf32>
    %23 = vector.extract_strided_slice %21 {offsets = [0, 0, 0, 1], sizes = [1, 4, 16, 15], strides = [1, 1, 1, 1]} : vector<1x4x16x16xf32> to vector<1x4x16x15xf32>
    %24 = tpu.concatenate %23, %22 in 3 : vector<1x4x16x15xf32>, vector<1x4x16x1xf32> -> vector<1x4x16x16xf32>
    %25 = vector.extract_strided_slice %21 {offsets = [0, 0, 0, 0], sizes = [1, 4, 16, 15], strides = [1, 1, 1, 1]} : vector<1x4x16x16xf32> to vector<1x4x16x15xf32>
    %26 = tpu.concatenate %22, %25 in 3 : vector<1x4x16x1xf32>, vector<1x4x16x15xf32> -> vector<1x4x16x16xf32>
    %27 = arith.maximumf %24, %26 : vector<1x4x16x16xf32>
    %28 = arith.maximumf %21, %27 : vector<1x4x16x16xf32>
    %c0_6 = arith.constant 0 : index
    %c0_7 = arith.constant 0 : index
    %c0_8 = arith.constant 0 : index
    %c0_9 = arith.constant 0 : index
    %c0_10 = arith.constant 0 : index
    %29 = vector.load %arg3[%c0_6, %c0_7, %c0_8, %c0_9, %c0_10] : memref<1x3x4x16x16xf32, #tpu.memory_space<vmem>>, vector<1x1x4x16x16xf32>
    %30 = vector.shape_cast %29 : vector<1x1x4x16x16xf32> to vector<1x4x16x16xf32>
    %31 = vector.shape_cast %0 : vector<1x4x16x16xf32> to vector<1x1x4x16x16xf32>
    tpu.vector_store %arg3[%c0_6, %c0_7, %c0_8, %c0_9, %c0_10], %31 {strides = array<i32>} : memref<1x3x4x16x16xf32, #tpu.memory_space<vmem>>, vector<1x1x4x16x16xf32>,
    %c0_11 = arith.constant 0 : index
    %c1 = arith.constant 1 : index
    %c0_12 = arith.constant 0 : index
    %c0_13 = arith.constant 0 : index
    %c0_14 = arith.constant 0 : index
    %32 = vector.load %arg3[%c0_11, %c1, %c0_12, %c0_13, %c0_14] : memref<1x3x4x16x16xf32, #tpu.memory_space<vmem>>, vector<1x1x4x16x16xf32>
    %33 = vector.shape_cast %32 : vector<1x1x4x16x16xf32> to vector<1x4x16x16xf32>
    %34 = vector.shape_cast %14 : vector<1x4x16x16xf32> to vector<1x1x4x16x16xf32>
    tpu.vector_store %arg3[%c0_11, %c1, %c0_12, %c0_13, %c0_14], %34 {strides = array<i32>} : memref<1x3x4x16x16xf32, #tpu.memory_space<vmem>>, vector<1x1x4x16x16xf32>,
    %c0_15 = arith.constant 0 : index
    %c2 = arith.constant 2 : index
    %c0_16 = arith.constant 0 : index
    %c0_17 = arith.constant 0 : index
    %c0_18 = arith.constant 0 : index
    %35 = vector.load %arg3[%c0_15, %c2, %c0_16, %c0_17, %c0_18] : memref<1x3x4x16x16xf32, #tpu.memory_space<vmem>>, vector<1x1x4x16x16xf32>
    %36 = vector.shape_cast %35 : vector<1x1x4x16x16xf32> to vector<1x4x16x16xf32>
    %37 = vector.shape_cast %28 : vector<1x4x16x16xf32> to vector<1x1x4x16x16xf32>
    tpu.vector_store %arg3[%c0_15, %c2, %c0_16, %c0_17, %c0_18], %37 {strides = array<i32>} : memref<1x3x4x16x16xf32, #tpu.memory_space<vmem>>, vector<1x1x4x16x16xf32>,
    return
  }
  func.func @transform_0(%arg0: i32, %arg1: i32) -> (i32, i32, i32, i32) {
    %c0_i32 = arith.constant 0 : i32
    %c0_i32_0 = arith.constant 0 : i32
    %c0_i32_1 = arith.constant 0 : i32
    return %arg0, %arg1, %c0_i32, %c0_i32_0 : i32, i32, i32, i32
  }
  func.func @transform_1(%arg0: i32, %arg1: i32) -> (i32, i32, i32, i32, i32) {
    %c0_i32 = arith.constant 0 : i32
    %c0_i32_0 = arith.constant 0 : i32
    %c0_i32_1 = arith.constant 0 : i32
    %c0_i32_2 = arith.constant 0 : i32
    return %arg0, %c0_i32, %arg1, %c0_i32_0, %c0_i32_1 : i32, i32, i32, i32, i32
  }
}

</mosaic_0001>

<bundles_post_ra>
// kernel: tpu_custom_call.1
= control target key start
LH: loop header
LB: loop body
LE: loop exit
PB: predicated region body
PF: predicated region fallthrough
CT: control target
= control target key end

     0   :  { %6 = vsyncpa [#allocation3], 0  ;;  %s1215_s0 = inlined_call_operand.hbm [shape: f32[2,4,16,16], index: 0, kind: input, shape index: {}]   ;;  %s1216_s1 = inlined_call_operand.hbm [shape: f32[2,3,4,16,16], index: 1, kind: output, shape index: {}]  }
   0x1   :  { %8 = vsyncpa [#allocation3 + $0x1], 0 }
   0x2   :  { %9 = vsyncpa [#allocation4], 0 }
   0x3   :  { %11 = vsyncpa [#allocation4 + $0x1], 0  ;;  %s846_s6 = smov 0   ;;  %s848_s7 = smov 0  }
   0x4   :  { %s850_s8 = smov 0   ;;  %s852_s9 = smov 0  }
   0x5   :  { %s854_s10 = smov 0   ;;  %s856_s11 = smov 0  }
   0x6 LB: > { %s619_s12 = sadd.s32 4294967295, %s826_s11   ;;  %s620_s13 = sadd.s32 4294967294, %s826_s11   ;;  %s826_s11 = sphi %s856_s11, %s17_s11   ;;  %s822_s10 = sphi %s854_s10, %s1227_s10   ;;  %s818_s9 = sphi %s852_s9, %s1226_s9   ;;  %s814_s8 = sphi %s850_s8, %s1225_s8   ;;  %s810_s7 = sphi %s848_s7, %s1224_s7   ;;  %s806_s6 = sphi %s846_s6, %s1223_s6  }
   0x7   : > { %s29_s14 = sadd.s32 1, %s822_s10  ;;  %s38_s15 = sadd.s32 1, %s814_s8 }
   0x8   : > { %p31_p0 = scmp.ge.s32.totalorder %s29_s14, 2  ;;  %p45_p1 = scmp.ne.s32.totalorder %s814_s8, %s810_s7 }
   0x9   : > { %p46_p2 = scmp.eq.s32.totalorder %s826_s11, 0  ;;  %p51_p3 = scmp.ne.s32.totalorder %s810_s7, %s806_s6 }
   0xa   : > { %s1229_s14 = smov (%p31_p0, %s29_s14), 0  ;;  %p52_p5 = scmp.eq.s32.totalorder %s619_s12, 0 }
   0xb   : > { %p887_p4 = por %p46_p2, %p45_p1  ;;  %s33_s17 = ssub.s32 %s822_s10, %s1229_s14 }
   0xc   : > { %p77_p6 = scmp.eq.s32.totalorder %s619_s12, 1  ;;  %p36_p7 = scmp.eq.s32.totalorder %s33_s17, 0 }
   0xd   : > { %p893_p8 = por %p52_p5, %p51_p3  ;;  %p83_p10 = scmp.eq.s32.totalorder %s620_s13, 1 }
   0xe   : > { %p897_p9 = por %p77_p6, %p45_p1  ;;  %p662_p13 = scmp.lt.s32.totalorder %s826_s11, 2 }
   0xf   : > { %s902_s20 = scalar_select %p36_p7, %s814_s8, %s38_s15  }
  0x10   : > { %p904_p11 = por %p83_p10, %p51_p3  ;;  %s103_s22 = sand.u32 1, %s814_s8  }
  0x11   : > { %s623_s23 = sshll.u32 %s103_s22, 6  ;;  %s647_s24 = sshll.u32 %s822_s10, 10 }
  0x12   : > { %s116_s27 = scalar_lea.hbm %s1215_s0, %s647_s24  ;;  %s107_s28 = scalar_lea.vmem [#allocation2], %s623_s23 }
  0x13   : > { %s117_s29 = sshll.u32 %s107_s28, 4  ;;  %p917_p0 = pnand %p662_p13, %p887_p4  ;;  %s118_s29 = int_to_ptr.vmem [resolvable:$true] %s117_s29 }
  0x14   : > { %p626_p1 = scmp.ge.s32.totalorder %s826_s11, 1  ;;  %s104_s2 = scalar_lea.sflag [#allocation3], %s103_s22 }
  0x15   : > { %p720_p2 = pneg %p917_p0  ;;  %s731_s3 = scalar_lea.vmem %s118_s29, 1024 }
  0x16   : > { %p732_p3 = scmp.ne.s32.totalorder %s118_s29, %s731_s3  ;;  %s828_s4 = smov [#allocation2]  }
  0x17   : > { %s736_s5 = sshll.u32 %s828_s4, 4  ;;  %s737_s5 = int_to_ptr.vmem [resolvable:$false] %s736_s5 }
  0x18   : > { %p734_p5 = pnand %p732_p3, %p720_p2  ;;  %s738_s12 = scalar_lea.vmem %s737_s5, 2048 }
  0x19   : > { %p739_p7 = scmp.lt.s32.totalorder %s118_s29, %s737_s5  ;;  %p740_p10 = scmp.lt.s32.totalorder %s738_s12, %s731_s3 }
  0x1a   : > { %p735_p6 = pneg %p734_p5 }
  0x1b   : > { %p741_p12 = por %p740_p10, %p739_p7 }
  0x1d   : > { %p742_p4 = pnand %p741_p12, %p735_p6 }
  0x1f   : > { %745 = shalt.err (!%p742_p4)
}
  0x20   : > { %s829_s13 = smov 128   ;;  %s830_s15 = smov 8  }
  0x21   : > { %657 = dma.hbm_to_vmem [thread:$0]  (!%p917_p0), %s116_s27, 1024, %s118_s29, %s104_s2, %s829_s13, %s829_s13, %s830_s15  }
  0x22   : > { %p125_p13 = scmp.lt.s32.totalorder %s826_s11, 3 }
  0x24   : > { %p126_p2 = pnand %p626_p1, %p125_p13 }
  0x25   : > { %s930_s16 = sand.u32 (!%p126_p2), 1, %s810_s7  }
  0x26   : > { %129 = sbr.rel (%p126_p2) target bundleno = 361 (0x169), region = 24  ;;  %s627_s17 = sshll.u32 (!%p126_p2), %s930_s16, 6 }
  0x27   : > { %s132_s22 = scalar_lea.sflag (!%p126_p2), [#allocation3], %s930_s16  ;;  %s934_s23 = scalar_lea.vmem (!%p126_p2), [#allocation2], %s627_s17 }
  0x2b   : > { %797 = dma.done.wait (%p893_p8), %s132_s22, 1024  }
  0x2c   : > { %799 = vsyncadd (%p893_p8), %s132_s22, 4294966272  ;;  %s648_s24 = smul.u32 192, %s930_s16  ;;  %vm172_vm0 = vcmask 1046528   ;;  %v158_v0 = vld [vmem:[%s934_s23 + $0x10] sm:$0xff]  ;;  %v159_v1 = vld [vmem:[%s934_s23 + $0x18] sm:$0xff]  ;;  %vm197_vm1 = vcmask 1040384  }
  0x2d   : > { %vm488_vm2 = vcmask 130048   ;;  %v156_v2 = vld [vmem:[%s934_s23] sm:$0xff]  ;;  %v176_v3 = vrot.slane %v158_v0, 1  ;;  %v177_v4 = vrot.slane %v159_v1, 1  ;;  %v201_v5 = vrot.slane %v158_v0, 7  ;;  %v157_v6 = vld [vmem:[%s934_s23 + $0x8] sm:$0xff] }
  0x2e   : > { %s944_s18 = scalar_lea.vmem [#allocation5], %s648_s24  ;;  %v173_v7 = vrot.slane %v156_v2, 1  ;;  %v160_v8 = vld [vmem:[%s934_s23 + $0x20] sm:$0xff]  ;;  %v174_v9 = vrot.slane %v157_v6, 1  ;;  %v198_v10 = vrot.slane %v156_v2, 7  ;;  %v202_v11 = vrot.slane %v159_v1, 7 }
  0x2f   : > { %491 = vst.msk [vmem:[%s944_s18 + $0x10] sm:$0xff] %vm488_vm2, %v158_v0  ;;  %492 = vst.msk [vmem:[%s944_s18 + $0x18] sm:$0xff] %vm488_vm2, %v159_v1  ;;  %v199_v12 = vrot.slane %v157_v6, 7  ;;  %v161_v13 = vld [vmem:[%s934_s23 + $0x28] sm:$0xff]  ;;  %v162_v14 = vld [vmem:[%s934_s23 + $0x30] sm:$0xff]  ;;  %v178_v15 = vsel %vm172_vm0, %v176_v3, %v177_v4  ;;  %v219_v16 = vsel %vm197_vm1, -inf, %v201_v5 }
  0x30   : > { %489 = vst.msk [vmem:[%s944_s18] sm:$0xff] %vm488_vm2, %v156_v2  ;;  %490 = vst.msk [vmem:[%s944_s18 + $0x8] sm:$0xff] %vm488_vm2, %v157_v6  ;;  %v194_v17 = vsel %vm172_vm0, %v177_v4, -inf  ;;  %v180_v18 = vrot.slane %v161_v13, 1  ;;  %v163_v19 = vld [vmem:[%s934_s23 + $0x38] sm:$0xff]  ;;  %v224_v20 = vmax.f32 %v178_v15, %v219_v16  ;;  %v175_v21 = vsel %vm172_vm0, %v173_v7, %v174_v9  ;;  %s831_s25 = smov 127  }
  0x31   : > { %493 = vst.msk [vmem:[%s944_s18 + $0x20] sm:$0xff] %vm488_vm2, %v160_v8  ;;  %494 = vst.msk [vmem:[%s944_s18 + $0x28] sm:$0xff] %vm488_vm2, %v161_v13  ;;  %v218_v22 = vsel %vm197_vm1, -inf, %v198_v10  ;;  %v203_v23 = vsel %vm197_vm1, %v201_v5, %v202_v11  ;;  %v193_v26 = vsel %vm172_vm0, %v174_v9, -inf  ;;  %v200_v27 = vsel %vm197_vm1, %v198_v10, %v199_v12  ;;  %s832_s26 = smov 1   ;;  %s649_s27 = smul.u32 3072, %s818_s9 }
  0x32   : > { %495 = vst.msk [vmem:[%s944_s18 + $0x30] sm:$0xff] %vm488_vm2, %v162_v14  ;;  %496 = vst.msk [vmem:[%s944_s18 + $0x38] sm:$0xff] %vm488_vm2, %v163_v19  ;;  %v222_v24 = vmax.f32 %v175_v21, %v218_v22  ;;  %v225_v25 = vmax.f32 %v194_v17, %v203_v23  ;;  %v975_v28 = vmax.f32 %v158_v0, %v224_v20  ;;  %v195_v30 = vsel %vm172_vm0, %v180_v18, -inf  ;;  %s532_s28 = sshll.u32 %s944_s18, 4  ;;  %s516_s2 = scalar_lea.sflag [#allocation4], %s930_s16  ;;  %s1162_s28 = int_to_ptr.vmem [resolvable:$true] %s532_s28 }
  0x33   : > { %v223_v29 = vmax.f32 %v193_v26, %v200_v27  ;;  %v204_v31 = vrot.slane %v160_v8, 7  ;;  %v205_v34 = vrot.slane %v161_v13, 7  ;;  %v179_v35 = vrot.slane %v160_v8, 1  ;;  %s1160_s30 = scalar_lea.hbm %s1216_s1, %s649_s27  ;;  %s746_s3 = scalar_lea.vmem %s1162_s28, 3072 }
  0x34   : > { %v978_v32 = vmax.f32 %v156_v2, %v222_v24  ;;  %v980_v33 = vmax.f32 %v159_v1, %v225_v25  ;;  %250 = vrot.lane.b32.xlu1 %v975_v28, %s831_s25  ;;  %v183_v38 = vrot.slane %v163_v19, 1  ;;  %v207_v39 = vrot.slane %v162_v14, 7  ;;  %p747_p8 = scmp.ne.s32.totalorder %s1162_s28, %s746_s3  ;;  %s833_s4 = smov [#allocation5]  }
  0x35   : > { %v231_v36 = vmax.f32 %v157_v6, %v223_v29  ;;  %v220_v37 = vsel %vm197_vm1, -inf, %v204_v31  ;;  %v206_v40 = vsel %vm197_vm1, %v204_v31, %v205_v34  ;;  %v181_v41 = vsel %vm172_vm0, %v179_v35, %v180_v18  ;;  %s750_s5 = sshll.u32 %s833_s4, 4  ;;  %s751_s5 = int_to_ptr.vmem [resolvable:$false] %s750_s5 }
  0x36   : > { %246 = vrot.lane.b32.xlu0 %v978_v32, %s831_s25  ;;  %v208_v42 = vrot.slane %v163_v19, 7  ;;  %v182_v43 = vrot.slane %v162_v14, 1  ;;  %v227_v44 = vmax.f32 %v195_v30, %v206_v40  ;;  %v226_v45 = vmax.f32 %v181_v41, %v220_v37  ;;  %p748_p12 = pnand %p747_p8, %p897_p9  ;;  %s752_s12 = scalar_lea.vmem %s751_s5, 6144 }
  0x37   : > { %v196_v46 = vsel %vm172_vm0, %v183_v38, -inf  ;;  %v221_v47 = vsel %vm197_vm1, -inf, %v207_v39  ;;  %vm303_vm3 = vcmask 7168   ;;  %vm270_vm4 = vcmask 121856   ;;  %p753_p1 = scmp.lt.s32.totalorder %s1162_s28, %s751_s5  ;;  %p754_p3 = scmp.lt.s32.totalorder %s752_s12, %s746_s3 }
  0x38   : > { %v209_v48 = vsel %vm197_vm1, %v207_v39, %v208_v42  ;;  %v184_v49 = vsel %vm172_vm0, %v182_v43, %v183_v38  ;;  %252 = vrot.lane.b32.xlu1 %v980_v33, %s831_s25  ;;  %v995_v50 = vmax.f32 %v161_v13, %v227_v44  ;;  %v998_v52 = vmax.f32 %v160_v8, %v226_v45  ;;  %p749_p0 = pneg %p748_p12 }
  0x39   : > { %v229_v51 = vmax.f32 %v196_v46, %v209_v48  ;;  %v228_v53 = vmax.f32 %v184_v49, %v221_v47  ;;  %p755_p5 = por %p754_p3, %p753_p1 }
  0x3a   : > { %248 = vrot.lane.b32.xlu0 %v231_v36, %s831_s25 }
  0x3b   : > { %v1002_v54 = vmax.f32 %v163_v19, %v229_v51  ;;  %v1006_v55 = vmax.f32 %v162_v14, %v228_v53  ;;  %p756_p6 = pnand %p755_p5, %p749_p0 }
  0x3c   : > { %256 = vrot.lane.b32.xlu1 %v995_v50, %s831_s25 }
  0x3e   : > { %254 = vrot.lane.b32.xlu0 %v998_v52, %s831_s25 }
  0x40   : > { %260 = vrot.lane.b32.xlu1 %v1002_v54, %s831_s25 }
  0x42   : > { %258 = vrot.lane.b32.xlu0 %v1006_v55, %s831_s25 }
  0x44   : > { %281 = vrot.lane.b32.xlu1 %v231_v36, %s832_s26 }
  0x46   : > { %279 = vrot.lane.b32.xlu0 %v978_v32, %s832_s26 }
  0x48   : > { %285 = vrot.lane.b32.xlu1 %v980_v33, %s832_s26 }
  0x4a   : > { %283 = vrot.lane.b32.xlu0 %v975_v28, %s832_s26 }
  0x4c   : > { %289 = vrot.lane.b32.xlu1 %v995_v50, %s832_s26 }
  0x4e   : > { %287 = vrot.lane.b32.xlu0 %v998_v52, %s832_s26 }
  0x50   : > { %293 = vrot.lane.b32.xlu1 %v1002_v54, %s832_s26 }
  0x52   : > { %291 = vrot.lane.b32.xlu0 %v1006_v55, %s832_s26 }
  0xa6   : > { %v251_v56 = vpop.permute.xlu1 %250 }
  0xa7   : > { %v273_v8 = vsel %vm270_vm4, %v251_v56, -inf }
  0xa8   : > { %v247_v57 = vpop.permute.xlu0 %246 }
  0xa9   : > { %v271_v4 = vsel %vm270_vm4, %v247_v57, -inf }
  0xaa   : > { %v253_v58 = vpop.permute.xlu1 %252 }
  0xab   : > { %v274_v11 = vsel %vm270_vm4, %v253_v58, -inf }
  0xac   : > { %v249_v59 = vpop.permute.xlu0 %248 }
  0xad   : > { %v272_v1 = vsel %vm270_vm4, %v249_v59, -inf }
  0xae   : > { %v257_v60 = vpop.permute.xlu1 %256 }
  0xaf   : > { %v276_v12 = vsel %vm270_vm4, %v257_v60, -inf }
  0xb0   : > { %v255_v61 = vpop.permute.xlu0 %254 }
  0xb1   : > { %v275_v20 = vsel %vm270_vm4, %v255_v61, -inf }
  0xb2   : > { %v261_v62 = vpop.permute.xlu1 %260 }
  0xb3   : > { %v278_v24 = vsel %vm270_vm4, %v261_v62, -inf }
  0xb4   : > { %v259_v63 = vpop.permute.xlu0 %258 }
  0xb5   : > { %v277_v25 = vsel %vm270_vm4, %v259_v63, -inf }
  0xb6   : > { %v282_v0 = vpop.permute.xlu1 %281 }
  0xb7   : > { %v305_v2 = vsel %vm303_vm3, -inf, %v282_v0 }
  0xb8   : > { %v280_v3 = vpop.permute.xlu0 %279  ;;  %v313_v5 = vmax.f32 %v272_v1, %v305_v2 }
  0xb9   : > { %v304_v6 = vsel %vm303_vm3, -inf, %v280_v3 }
  0xba   : > { %v312_v7 = vmax.f32 %v271_v4, %v304_v6  ;;  %v321_v9 = vmax.f32 %v231_v36, %v313_v5  ;;  %v286_v10 = vpop.permute.xlu1 %285 }
  0xbb   : > { %v307_v14 = vsel %vm303_vm3, -inf, %v286_v10 }
  0xbc   : > { %v320_v13 = vmax.f32 %v978_v32, %v312_v7  ;;  %v284_v15 = vpop.permute.xlu0 %283  ;;  %629 = vst.msk [vmem:[%s944_s18 + $0x48] sm:$0xff] %vm488_vm2, %v321_v9  ;;  %v315_v16 = vmax.f32 %v274_v11, %v307_v14  ;;  %v337_v18 = vrot.slane %v321_v9, 1  ;;  %v361_v19 = vrot.slane %v321_v9, 7 }
  0xbd   : > { %v306_v17 = vsel %vm303_vm3, -inf, %v284_v15 }
  0xbe   : > { %628 = vst.msk [vmem:[%s944_s18 + $0x40] sm:$0xff] %vm488_vm2, %v320_v13  ;;  %v314_v21 = vmax.f32 %v273_v8, %v306_v17  ;;  %v360_v22 = vrot.slane %v320_v13, 7  ;;  %v336_v23 = vrot.slane %v320_v13, 1  ;;  %v323_v26 = vmax.f32 %v980_v33, %v315_v16  ;;  %v290_v27 = vpop.permute.xlu1 %289 }
  0xbf   : > { %v356_v29 = vsel %vm172_vm0, %v337_v18, -inf  ;;  %v309_v31 = vsel %vm303_vm3, -inf, %v290_v27 }
  0xc0   : > { %v322_v30 = vmax.f32 %v975_v28, %v314_v21  ;;  %v288_v32 = vpop.permute.xlu0 %287  ;;  %v362_v34 = vsel %vm197_vm1, %v360_v22, %v361_v19  ;;  %v338_v35 = vsel %vm172_vm0, %v336_v23, %v337_v18  ;;  %631 = vst.msk [vmem:[%s944_s18 + $0x58] sm:$0xff] %vm488_vm2, %v323_v26  ;;  %v317_v36 = vmax.f32 %v276_v12, %v309_v31 }
  0xc1   : > { %v308_v37 = vsel %vm303_vm3, -inf, %v288_v32  ;;  %v385_v38 = vmax.f32 %v356_v29, %v362_v34  ;;  %v380_v33 = vsel %vm197_vm1, -inf, %v360_v22  ;;  %v340_v40 = vrot.slane %v323_v26, 1 }
  0xc2   : > { %630 = vst.msk [vmem:[%s944_s18 + $0x50] sm:$0xff] %vm488_vm2, %v322_v30  ;;  %v316_v39 = vmax.f32 %v275_v20, %v308_v37  ;;  %v384_v28 = vmax.f32 %v338_v35, %v380_v33  ;;  %v363_v41 = vrot.slane %v322_v30, 7  ;;  %v325_v42 = vmax.f32 %v995_v50, %v317_v36  ;;  %v294_v43 = vpop.permute.xlu1 %293 }
  0xc3   : > { %v1057_v44 = vmax.f32 %v321_v9, %v385_v38  ;;  %v364_v45 = vrot.slane %v323_v26, 7  ;;  %v339_v46 = vrot.slane %v322_v30, 1  ;;  %v311_v48 = vsel %vm303_vm3, -inf, %v294_v43 }
  0xc4   : > { %v324_v47 = vmax.f32 %v998_v52, %v316_v39  ;;  %v292_v49 = vpop.permute.xlu0 %291  ;;  %v1061_v51 = vmax.f32 %v320_v13, %v384_v28  ;;  %v357_v53 = vsel %vm172_vm0, %v340_v40, -inf  ;;  %633 = vst.msk [vmem:[%s944_s18 + $0x68] sm:$0xff] %vm488_vm2, %v325_v42  ;;  %v319_v56 = vmax.f32 %v278_v24, %v311_v48 }
  0xc5   : > { %v310_v50 = vsel %vm303_vm3, -inf, %v292_v49  ;;  %410 = vrot.lane.b32.xlu1 %v1057_v44, %s831_s25  ;;  %v365_v57 = vsel %vm197_vm1, %v363_v41, %v364_v45  ;;  %v341_v52 = vsel %vm172_vm0, %v339_v46, %v340_v40  ;;  %v381_v60 = vsel %vm197_vm1, -inf, %v363_v41 }
  0xc6   : > { %632 = vst.msk [vmem:[%s944_s18 + $0x60] sm:$0xff] %vm488_vm2, %v324_v47  ;;  %v318_v58 = vmax.f32 %v277_v25, %v310_v50  ;;  %408 = vrot.lane.b32.xlu0 %v1061_v51, %s831_s25  ;;  %v387_v59 = vmax.f32 %v357_v53, %v365_v57  ;;  %v343_v61 = vrot.slane %v325_v42, 1  ;;  %v327_v62 = vmax.f32 %v1002_v54, %v319_v56 }
  0xc7   : > { %v386_v63 = vmax.f32 %v341_v52, %v381_v60  ;;  %v366_v0 = vrot.slane %v324_v47, 7  ;;  %v367_v1 = vrot.slane %v325_v42, 7  ;;  %v342_v5 = vrot.slane %v324_v47, 1 }
  0xc8   : > { %v326_v2 = vmax.f32 %v1006_v55, %v318_v58  ;;  %v1078_v3 = vmax.f32 %v323_v26, %v387_v59  ;;  %v358_v4 = vsel %vm172_vm0, %v343_v61, -inf  ;;  %635 = vst.msk [vmem:[%s944_s18 + $0x78] sm:$0xff] %vm488_vm2, %v327_v62  ;;  %v346_v9 = vrot.slane %v327_v62, 1 }
  0xc9   : > { %v1083_v6 = vmax.f32 %v322_v30, %v386_v63  ;;  %v368_v7 = vsel %vm197_vm1, %v366_v0, %v367_v1  ;;  %v382_v8 = vsel %vm197_vm1, -inf, %v366_v0  ;;  %v344_v55 = vsel %vm172_vm0, %v342_v5, %v343_v61 }
  0xca   : > { %634 = vst.msk [vmem:[%s944_s18 + $0x70] sm:$0xff] %vm488_vm2, %v326_v2  ;;  %414 = vrot.lane.b32.xlu1 %v1078_v3, %s831_s25  ;;  %v389_v54 = vmax.f32 %v358_v4, %v368_v7  ;;  %v369_v10 = vrot.slane %v326_v2, 7  ;;  %v370_v11 = vrot.slane %v327_v62, 7  ;;  %v388_v12 = vmax.f32 %v344_v55, %v382_v8 }
  0xcb   : > { %412 = vrot.lane.b32.xlu0 %v1083_v6, %s831_s25  ;;  %v359_v13 = vsel %vm172_vm0, %v346_v9, -inf  ;;  %v345_v14 = vrot.slane %v326_v2, 1 }
  0xcc   : > { %v397_v15 = vmax.f32 %v325_v42, %v389_v54  ;;  %v371_v16 = vsel %vm197_vm1, %v369_v10, %v370_v11  ;;  %v383_v17 = vsel %vm197_vm1, -inf, %v369_v10  ;;  %v396_v18 = vmax.f32 %v324_v47, %v388_v12 }
  0xcd   : > { %v391_v19 = vmax.f32 %v359_v13, %v371_v16  ;;  %v347_v20 = vsel %vm172_vm0, %v345_v14, %v346_v9 }
  0xce   : > { %418 = vrot.lane.b32.xlu1 %v397_v15, %s831_s25  ;;  %v390_v21 = vmax.f32 %v347_v20, %v383_v17 }
  0xcf   : > { %416 = vrot.lane.b32.xlu0 %v396_v18, %s831_s25  ;;  %v1100_v22 = vmax.f32 %v327_v62, %v391_v19 }
  0xd0   : > { %v1102_v23 = vmax.f32 %v326_v2, %v390_v21 }
  0xd2   : > { %422 = vrot.lane.b32.xlu1 %v1100_v22, %s831_s25 }
  0xd3   : > { %420 = vrot.lane.b32.xlu0 %v1102_v23, %s831_s25 }
  0xd6   : > { %442 = vrot.lane.b32.xlu1 %v1057_v44, %s832_s26 }
  0xd7   : > { %440 = vrot.lane.b32.xlu0 %v1061_v51, %s832_s26 }
  0xda   : > { %446 = vrot.lane.b32.xlu1 %v1078_v3, %s832_s26 }
  0xdb   : > { %444 = vrot.lane.b32.xlu0 %v1083_v6, %s832_s26 }
  0xde   : > { %450 = vrot.lane.b32.xlu1 %v397_v15, %s832_s26 }
  0xdf   : > { %448 = vrot.lane.b32.xlu0 %v396_v18, %s832_s26 }
  0xe2   : > { %454 = vrot.lane.b32.xlu1 %v1100_v22, %s832_s26 }
  0xe3   : > { %452 = vrot.lane.b32.xlu0 %v1102_v23, %s832_s26 }
 0x137   : > { %v411_v24 = vpop.permute.xlu1 %410 }
 0x138   : > { %v409_v25 = vpop.permute.xlu0 %408  ;;  %v433_v35 = vsel %vm270_vm4, %v411_v24, -inf }
 0x139   : > { %v432_v38 = vsel %vm270_vm4, %v409_v25, -inf }
 0x13c   : > { %v415_v26 = vpop.permute.xlu1 %414 }
 0x13d   : > { %v413_v27 = vpop.permute.xlu0 %412  ;;  %v435_v42 = vsel %vm270_vm4, %v415_v26, -inf }
 0x13e   : > { %v434_v47 = vsel %vm270_vm4, %v413_v27, -inf }
 0x140   : > { %v419_v29 = vpop.permute.xlu1 %418 }
 0x141   : > { %v417_v30 = vpop.permute.xlu0 %416 }
 0x142   : > { %v436_v58 = vsel %vm270_vm4, %v417_v30, -inf }
 0x144   : > { %v423_v31 = vpop.permute.xlu1 %422 }
 0x145   : > { %v421_v32 = vpop.permute.xlu0 %420  ;;  %v439_v0 = vsel %vm270_vm4, %v423_v31, -inf }
 0x146   : > { %v438_v4 = vsel %vm270_vm4, %v421_v32, -inf }
 0x148   : > { %v443_v34 = vpop.permute.xlu1 %442 }
 0x149   : > { %v465_v36 = vsel %vm303_vm3, -inf, %v443_v34  ;;  %v441_v37 = vpop.permute.xlu0 %440 }
 0x14a   : > { %v473_v33 = vmax.f32 %v433_v35, %v465_v36  ;;  %v464_v39 = vsel %vm303_vm3, -inf, %v441_v37 }
 0x14b   : > { %v472_v28 = vmax.f32 %v432_v38, %v464_v39 }
 0x14c   : > { %v481_v40 = vmax.f32 %v1057_v44, %v473_v33  ;;  %v447_v41 = vpop.permute.xlu1 %446 }
 0x14d   : > { %v480_v43 = vmax.f32 %v1061_v51, %v472_v28  ;;  %v467_v45 = vsel %vm303_vm3, -inf, %v447_v41  ;;  %v445_v46 = vpop.permute.xlu0 %444  ;;  %v437_v51 = vsel %vm270_vm4, %v419_v29, -inf }
 0x14e   : > { %637 = vst.msk [vmem:[%s944_s18 + $0x88] sm:$0xff] %vm488_vm2, %v481_v40  ;;  %v475_v48 = vmax.f32 %v435_v42, %v467_v45  ;;  %v466_v49 = vsel %vm303_vm3, -inf, %v445_v46 }
 0x14f   : > { %636 = vst.msk [vmem:[%s944_s18 + $0x80] sm:$0xff] %vm488_vm2, %v480_v43  ;;  %v474_v44 = vmax.f32 %v434_v47, %v466_v49 }
 0x150   : > { %v483_v53 = vmax.f32 %v1078_v3, %v475_v48  ;;  %v451_v56 = vpop.permute.xlu1 %450 }
 0x151   : > { %v482_v50 = vmax.f32 %v1083_v6, %v474_v44  ;;  %v469_v57 = vsel %vm303_vm3, -inf, %v451_v56  ;;  %v449_v52 = vpop.permute.xlu0 %448 }
 0x152   : > { %639 = vst.msk [vmem:[%s944_s18 + $0x98] sm:$0xff] %vm488_vm2, %v483_v53  ;;  %v477_v59 = vmax.f32 %v437_v51, %v469_v57  ;;  %v468_v60 = vsel %vm303_vm3, -inf, %v449_v52 }
 0x153   : > { %638 = vst.msk [vmem:[%s944_s18 + $0x90] sm:$0xff] %vm488_vm2, %v482_v50  ;;  %v476_v61 = vmax.f32 %v436_v58, %v468_v60 }
 0x154   : > { %v485_v62 = vmax.f32 %v397_v15, %v477_v59  ;;  %v455_v63 = vpop.permute.xlu1 %454 }
 0x155   : > { %v484_v1 = vmax.f32 %v396_v18, %v476_v61  ;;  %v471_v2 = vsel %vm303_vm3, -inf, %v455_v63  ;;  %v453_v3 = vpop.permute.xlu0 %452 }
 0x156   : > { %641 = vst.msk [vmem:[%s944_s18 + $0xa8] sm:$0xff] %vm488_vm2, %v485_v62  ;;  %v479_v5 = vmax.f32 %v439_v0, %v471_v2  ;;  %v470_v6 = vsel %vm303_vm3, -inf, %v453_v3 }
 0x157   : > { %640 = vst.msk [vmem:[%s944_s18 + $0xa0] sm:$0xff] %vm488_vm2, %v484_v1  ;;  %v478_v7 = vmax.f32 %v438_v4, %v470_v6 }
 0x158   : > { %v487_v8 = vmax.f32 %v1100_v22, %v479_v5 }
 0x159   : > { %v486_v9 = vmax.f32 %v1102_v23, %v478_v7 }
 0x15a   : > { %643 = vst.msk [vmem:[%s944_s18 + $0xb8] sm:$0xff] %vm488_vm2, %v487_v8 }
 0x15b   : > { %642 = vst.msk [vmem:[%s944_s18 + $0xb0] sm:$0xff] %vm488_vm2, %v486_v9 }
 0x15c   : > { %759 = shalt.err (!%p756_p6)
}
 0x15d   : > { %s760_s13 = scalar_lea.hbm %s1160_s30, 3072  ;;  %s764_s22 = scalar_lea.hbm %s1216_s1, 6144 }
 0x15e   : > { %p761_p7 = scmp.ne.s32.totalorder %s1160_s30, %s760_s13  ;;  %p765_p13 = scmp.lt.s32.totalorder %s1160_s30, %s1216_s1 }
 0x15f   : > { %p766_p2 = scmp.lt.s32.totalorder %s764_s22, %s760_s13 }
 0x160   : > { %p762_p10 = pnand %p761_p7, %p897_p9 }
 0x161   : > { %p767_p8 = por %p766_p2, %p765_p13 }
 0x162   : > { %p763_p4 = pneg %p762_p10 }
 0x164   : > { %p768_p12 = pnand %p767_p8, %p763_p4 }
 0x166   : > { %771 = shalt.err (!%p768_p12)
}
 0x167   : > { %s834_s18 = smov 128   ;;  %s835_s25 = smov 8  }
 0x168   : > { %652 = dma.vmem_to_hbm [thread:$0]  (%p897_p9), %s1162_s28, 3072, %s1160_s30, %s516_s2, %s834_s18, %s834_s18, %s835_s25  }
 0x169 PF: > { %s547_s26 = sand.u32 1, %s806_s6   ;;  %p1222_p0 = scmp.ge.s32.totalorder %s826_s11, 2 }
 0x16a   : > { %s548_s27 = scalar_lea.sflag [#allocation4], %s547_s26 }
 0x16b   : > { %p659_p1 = pnand %p1222_p0, %p904_p11 }
 0x16d   : > { %p660_p3 = pneg %p659_p1 }
 0x16f   : > { %801 = dma.done.wait (%p660_p3), %s548_s27, 3072  }
 0x170   : > { %803 = vsyncadd (%p660_p3), %s548_s27, 4294964224  ;;  %s17_s11 = sadd.s32 1, %s826_s11   ;;  %s1223_s6 = smov %s810_s7 }
 0x171   : > { %p14_p5 = scmp.ge.s32.totalorder %s17_s11, 4   ;;  %s1224_s7 = smov %s814_s8 }
 0x172   : > { %s1225_s8 = smov %s902_s20  ;;  %s1226_s9 = smov %s822_s10 }
 0x173   : > { %s1227_s10 = smov %s1229_s14  ;;  %16 = sbr.rel (!%p14_p5) target bundleno = 6 (0x6), region = 71 }
 0x178   :  { %553 = vsyncpa [#allocation3], 1 }
 0x179   :  { %555 = vsyncpa [#allocation3 + $0x1], 1 }
 0x17a   :  { %556 = vsyncpa [#allocation4], 1 }
 0x17b   :  { %558 = vsyncpa [#allocation4 + $0x1], 1 }

</bundles_post_ra>
